<compile_context>
chip_gen: v7x
topology: tpu7x:2x2x1
jax: 0.10.0
libtpu: 0.0.40
codegen_flags: <defaults>
</compile_context>

<pallas_src>
import functools

import jax
import jax.numpy as jnp
from jax.experimental import pallas as pl
from jax.experimental.pallas import tpu as pltpu


def _round_up(x: int, m: int) -> int:
    return ((x + m - 1) // m) * m


def _device_kind() -> str:
    try:
        return jax.devices()[0].device_kind.lower()
    except Exception:
        return ""


def _grid_semantics():
    # Only CORE_PARALLEL actually shards a grid axis across v7x's two
    # TensorCores; plain PARALLEL is the safe/no-op choice everywhere else.
    if "v7" in _device_kind():
        return (pltpu.CORE_PARALLEL,)
    return (pltpu.PARALLEL,)


def _compute_dtype(in_dtype):
    # bf16 max / == are exact and halve vreg + vld pressure, but only v6e/v7x
    # have a bf16 VPU; on v5e (and unknown chips) keep the exact f32 upcast.
    if in_dtype == jnp.bfloat16:
        kind = _device_kind()
        if ("v6" in kind) or ("v7" in kind):
            return jnp.bfloat16
    return jnp.float32


# ----------------------------------------------------------------------------
# Tile sizing with real (padded) VMEM accounting.
# ----------------------------------------------------------------------------
_VMEM_BUDGET_BYTES = 20 * 1024 * 1024   # target double-buffered working set
_VMEM_LIMIT_FLOOR = 24 * 1024 * 1024    # explicit scoped-VMEM request


def _vmem_bytes_per_row(c: int, itemsize: int, with_row_out: bool) -> int:
    """Padded VMEM bytes one logical row occupies, per buffer, across all blocks."""
    row = _round_up(c, 128) * itemsize      # logits (TN, C): lanes pad to 128
    row += 128 * 4                          # targets (TN, 1) i32: lanes pad to 128
    if with_row_out:
        row += 128 * 4                      # 'none' error out (TN, 1) f32
    return row


def _choose_tile_rows(n: int, c: int, itemsize: int, with_row_out: bool) -> int:
    per_row_db = 2 * _vmem_bytes_per_row(c, itemsize, with_row_out)   # x2 buffers
    tn = max(1, _VMEM_BUDGET_BYTES // per_row_db)
    # Sublane packing alignment: 8 for 32-bit, 16 for bf16, 32 for int8/fp8.
    align = max(8, 32 // max(1, itemsize))
    if tn >= 512:
        tn = (tn // 512) * 512
    else:
        tn = max(align, (tn // align) * align)
    tn = min(tn, _round_up(n, align))       # small inputs: one full block
    return max(tn, align)


# ----------------------------------------------------------------------------
# Kernels.
# ----------------------------------------------------------------------------
def _argmax_last(x, c):
    """First-occurrence argmax along the last axis. x: (rows, C) -> (rows, 1) i32."""
    max_val = jnp.max(x, axis=-1, keepdims=True)                  # (rows, 1)
    col_idx = jax.lax.broadcasted_iota(jnp.int32, x.shape, 1)     # (rows, C)
    cand = jnp.where(x == max_val, col_idx, jnp.int32(c))         # (rows, C)
    return jnp.min(cand, axis=-1, keepdims=True)                  # (rows, 1)


def _detection_error_count_kernel(logits_ref, targets_ref, partial_ref, *,
                                  n_total, tile_rows, compute_dtype):
    """Per-tile error count (reduction='sum'/'mean').

    logits_ref : (TN, C)  native dtype, VMEM
    targets_ref: (TN, 1)  i32, VMEM
    partial_ref: (1, 1, 1) i32, VMEM  (one exact partial count per grid tile)
    """
    x = logits_ref[...].astype(compute_dtype)            # no-op or exact upcast
    tn, c = x.shape
    pred = _argmax_last(x, c)                             # (TN, 1) i32
    err = (pred != targets_ref[...]).astype(jnp.int32)    # (TN, 1) 0/1

    # Mask rows of the last partial tile that lie past the true N (garbage /
    # possibly-NaN padded rows must not contribute).
    base = pl.program_id(0) * tile_rows
    row = jax.lax.broadcasted_iota(jnp.int32, (tn, 1), 0)
    err = jnp.where((base + row) < n_total, err, 0)

    count = jnp.sum(err, axis=0, keepdims=True)            # (1, 1) i32, exact
    partial_ref[...] = count.reshape(1, 1, 1)


def _detection_error_none_kernel(logits_ref, targets_ref, err_ref, *,
                                 compute_dtype):
    """Per-row 0/1 error (reduction='none').  Out-of-bounds rows of the last
    partial tile are dropped by Pallas on writeback."""
    x = logits_ref[...].astype(compute_dtype)
    _, c = x.shape
    pred = _argmax_last(x, c)
    err_ref[...] = (pred != targets_ref[...]).astype(jnp.float32)


# ----------------------------------------------------------------------------
# Wrapper mirroring DetectionErrorLoss.forward.
# ----------------------------------------------------------------------------
def detection_error_loss(predicted_logits, true_targets, reduction: str = "mean",
                         tile_rows: int | None = None):
    if reduction not in ("none", "sum", "mean"):
        raise ValueError(f"Unkown reduction '{reduction}'")

    c = predicted_logits.shape[-1]
    # Stream the native dtype (halves HBM traffic for bf16); any upcast happens
    # in-register inside the kernel.
    logits2d = jnp.reshape(predicted_logits, (-1, c))                 # (N, C)
    n = logits2d.shape[0]
    targets2d = jnp.reshape(true_targets, (-1, 1)).astype(jnp.int32)  # (N, 1)
    assert targets2d.shape[0] == n, (
        "targets must flatten to the same length as the argmax output")

    itemsize = jnp.dtype(logits2d.dtype).itemsize
    compute_dtype = _compute_dtype(logits2d.dtype)
    with_row_out = reduction == "none"

    if tile_rows is None:
        tn = _choose_tile_rows(n, c, itemsize, with_row_out)
    else:
        tn = int(tile_rows)
    num_tiles = pl.cdiv(n, tn)
    grid = (num_tiles,)

    footprint = tn * 2 * _vmem_bytes_per_row(c, itemsize, with_row_out)
    vmem_limit = int(max(_VMEM_LIMIT_FLOOR, footprint + (4 << 20)))

    in_specs = [
        pl.BlockSpec((tn, c), lambda i: (i, 0)),
        pl.BlockSpec((tn, 1), lambda i: (i, 0)),
    ]
    cparams = pltpu.CompilerParams(
        dimension_semantics=_grid_semantics(),
        vmem_limit_bytes=vmem_limit,
    )

    if reduction == "none":
        err = pl.pallas_call(
            functools.partial(_detection_error_none_kernel,
                              compute_dtype=compute_dtype),
            out_shape=jax.ShapeDtypeStruct((n, 1), jnp.float32),
            grid=grid,
            in_specs=in_specs,
            out_specs=pl.BlockSpec((tn, 1), lambda i: (i, 0)),
            compiler_params=cparams,
        )(logits2d, targets2d)
        return jnp.reshape(err, (-1,))

    # 'sum' / 'mean': only one int32 partial count per tile leaves the kernel.
    partials = pl.pallas_call(
        functools.partial(_detection_error_count_kernel,
                          n_total=n, tile_rows=tn, compute_dtype=compute_dtype),
        out_shape=jax.ShapeDtypeStruct((num_tiles, 1, 1), jnp.int32),
        grid=grid,
        in_specs=in_specs,
        out_specs=pl.BlockSpec((1, 1, 1), lambda i: (i, 0, 0)),
        compiler_params=cparams,
    )(logits2d, targets2d)

    total = jnp.sum(partials).astype(jnp.float32)       # exact integer reduce
    if reduction == "sum":
        return total
    return total / jnp.float32(n)


def _reference(predicted_logits, true_targets, reduction):
    pred = jnp.argmax(predicted_logits, axis=-1).reshape(-1)
    err = (pred != true_targets.reshape(-1)).astype(jnp.float32)
    if reduction == "none":
        return err
    if reduction == "sum":
        return jnp.sum(err)
    return jnp.mean(err)


if __name__ == "__main__":
    key = jax.random.PRNGKey(0)

    # --- Test 1: small shapes implied by the forward (B, S, C) / (B, S), f32 ---
    B, S, C = 2, 8, 32
    k1, k2, k3, k4, k5 = jax.random.split(key, 5)
    logits = jax.random.normal(k1, (B, S, C), dtype=jnp.float32)
    targets = jax.random.randint(k2, (B, S), 0, C, dtype=jnp.int32)

    for red in ("mean", "sum", "none"):
        out = jax.block_until_ready(detection_error_loss(logits, targets, red))
        ref = _reference(logits, targets, red)
        assert out.shape == ref.shape, (red, out.shape, ref.shape)
        assert jnp.allclose(out, ref), (red, out, ref)

    # --- Test 2: multi-tile grid with a partial last tile (forced small tiles
    #     to exercise the masking / out-of-bounds writeback paths) ---
    B2, S2 = 4, 300                      # N = 1200 -> 5 tiles of 256, last partial
    logits2 = jax.random.normal(k3, (B2, S2, C), dtype=jnp.float32)
    targets2 = jax.random.randint(k4, (B2, S2), 0, C, dtype=jnp.int32)
    for red in ("mean", "none"):
        out = jax.block_until_ready(
            detection_error_loss(logits2, targets2, red, tile_rows=256))
        ref = _reference(logits2, targets2, red)
        assert jnp.allclose(out, ref), (red, out, ref)

    # --- Test 3: auto-sized tiles on the multi-row case ---
    out = jax.block_until_ready(detection_error_loss(logits2, targets2, "mean"))
    ref = _reference(logits2, targets2, "mean")
    assert jnp.allclose(out, ref), (out, ref)

    # --- Test 4: native bf16 logits (native-dtype compute on v6e/v7x, exact
    #     f32 upcast elsewhere) ---
    logits_bf16 = jax.random.normal(k5, (B, S, C), dtype=jnp.bfloat16)
    out = jax.block_until_ready(detection_error_loss(logits_bf16, targets, "mean"))
    ref = _reference(logits_bf16, targets, "mean")
    assert jnp.allclose(out, ref), (out, ref)

    print("KERNEL_OK")
</pallas_src>

<mosaic_0001>
module attributes {stable_mosaic.version = 11 : i64} {
  func.func @_detection_error_count_kernel(%arg0: i32, %arg1: memref<16x32xf32, #tpu.memory_space<vmem>>, %arg2: memref<16x1xi32, #tpu.memory_space<vmem>>, %arg3: memref<1x1x1xi32, #tpu.memory_space<vmem>>) attributes {dimension_semantics = [#tpu.dimension_semantics<parallel>], iteration_bounds = array<i64: 1>, scalar_prefetch = 0 : i64, scratch_operands = 0 : i64, tpu.core_type = #tpu.core_type<tc>, window_params = [{transform_indices = @transform_0, window_bounds = array<i64: 16, 32>}, {transform_indices = @transform_1, window_bounds = array<i64: 16, 1>}, {transform_indices = @transform_2, window_bounds = array<i64: 1, 1, 1>}]} {
    %c0 = arith.constant 0 : index
    %c0_0 = arith.constant 0 : index
    %0 = vector.load %arg1[%c0, %c0_0] : memref<16x32xf32, #tpu.memory_space<vmem>>, vector<16x32xf32>
    %cst = arith.constant dense<0xFF800000> : vector<16xf32>
    %1 = vector.multi_reduction <maximumf>, %0, %cst [1] : vector<16x32xf32> to vector<16xf32>
    %2 = vector.shape_cast %1 : vector<16xf32> to vector<16x1xf32>
    %3 = tpu.iota {dimensions = array<i32: 1>} : vector<16x32xi32>
    %4 = vector.broadcast %2 : vector<16x1xf32> to vector<16x32xf32>
    %5 = arith.cmpf oeq, %0, %4 : vector<16x32xf32>
    %c32_i32 = arith.constant 32 : i32
    %6 = vector.broadcast %c32_i32 : i32 to vector<16x32xi32>
    %7 = arith.select %5, %3, %6 : vector<16x32xi1>, vector<16x32xi32>
    %cst_1 = arith.constant dense<2147483647> : vector<16xi32>
    %8 = vector.multi_reduction <minsi>, %7, %cst_1 [1] : vector<16x32xi32> to vector<16xi32>
    %9 = vector.shape_cast %8 : vector<16xi32> to vector<16x1xi32>
    %c0_2 = arith.constant 0 : index
    %c0_3 = arith.constant 0 : index
    %10 = vector.load %arg2[%c0_2, %c0_3] : memref<16x1xi32, #tpu.memory_space<vmem>>, vector<16x1xi32>
    %11 = arith.cmpi ne, %9, %10 : vector<16x1xi32>
    %12 = arith.extui %11 : vector<16x1xi1> to vector<16x1xi32>
    %c16_i32 = arith.constant 16 : i32
    %13 = arith.muli %arg0, %c16_i32 : i32
    %14 = tpu.iota {dimensions = array<i32: 0>} : vector<16x1xi32>
    %15 = vector.broadcast %13 : i32 to vector<16x1xi32>
    %16 = arith.addi %15, %14 : vector<16x1xi32>
    %c16_i32_4 = arith.constant 16 : i32
    %17 = vector.broadcast %c16_i32_4 : i32 to vector<16x1xi32>
    %18 = arith.cmpi slt, %16, %17 : vector<16x1xi32>
    %c0_i32 = arith.constant 0 : i32
    %19 = vector.broadcast %c0_i32 : i32 to vector<16x1xi32>
    %20 = arith.select %18, %12, %19 : vector<16x1xi1>, vector<16x1xi32>
    %cst_5 = arith.constant dense<0> : vector<1xi32>
    %21 = vector.multi_reduction <add>, %20, %cst_5 [0] : vector<16x1xi32> to vector<1xi32>
    %22 = vector.shape_cast %21 : vector<1xi32> to vector<1x1xi32>
    %23 = vector.shape_cast %22 : vector<1x1xi32> to vector<1x1x1xi32>
    %c0_6 = arith.constant 0 : index
    %c0_7 = arith.constant 0 : index
    %c0_8 = arith.constant 0 : index
    %24 = vector.load %arg3[%c0_6, %c0_7, %c0_8] : memref<1x1x1xi32, #tpu.memory_space<vmem>>, vector<1x1x1xi32>
    tpu.vector_store %arg3[%c0_6, %c0_7, %c0_8], %23 {strides = array<i32>} : memref<1x1x1xi32, #tpu.memory_space<vmem>>, vector<1x1x1xi32>,
    return
  }
  func.func @transform_0(%arg0: i32) -> (i32, i32) {
    %c0_i32 = arith.constant 0 : i32
    %c0_i32_0 = arith.constant 0 : i32
    return %arg0, %c0_i32 : i32, i32
  }
  func.func @transform_1(%arg0: i32) -> (i32, i32) {
    %c0_i32 = arith.constant 0 : i32
    %c0_i32_0 = arith.constant 0 : i32
    return %arg0, %c0_i32 : i32, i32
  }
  func.func @transform_2(%arg0: i32) -> (i32, i32, i32) {
    %c0_i32 = arith.constant 0 : i32
    %c0_i32_0 = arith.constant 0 : i32
    %c0_i32_1 = arith.constant 0 : i32
    return %arg0, %c0_i32, %c0_i32_0 : i32, i32, i32
  }
}

</mosaic_0001>

<bundles_post_ra>
// kernel: tpu_custom_call.1
= control target key start
LH: loop header
LB: loop body
LE: loop exit
PB: predicated region body
PF: predicated region fallthrough
CT: control target
= control target key end

     0   :  { %vm14_vm0 = vcmask 261120   ;;  %s171_s0 = inlined_call_operand.vmem [shape: f32[16,32], index: 0, kind: input, shape index: {}]   ;;  %s172_s1 = inlined_call_operand.vmem [shape: s32[16,1], index: 1, kind: input, shape index: {}]   ;;  %s173_s2 = inlined_call_operand.hbm [shape: s32[1,1,1], index: 2, kind: output, shape index: {}]  }
   0x1   :  { %v12_v0 = vld [vmem:[%s171_s0] sm:$0xff]  ;;  %v13_v1 = vld [vmem:[%s171_s0 + $0x8] sm:$0xff] }
   0x2   :  { %7 = vsyncpa [#allocation3], 0  ;;  %v15_v2 = vsel %vm14_vm0, %v12_v0, -inf  ;;  %v18_v3 = vsel %vm14_vm0, %v13_v1, -inf  ;;  %v21_v4 = vlaneseq  ;;  %v57_v29 = vld [vmem:[%s172_s1] sm:$0xff]  ;;  %v58_v34 = vld [vmem:[%s172_s1 + $0x8] sm:$0xff] }
   0x3   :  { %16 = vmax.xlane.f32.xlu0 %v15_v2  ;;  %vm74_vm6 = vcmask 7168   ;;  %v126_v36 = vmov 0   ;;  %s127_s16 = smov [#allocation2]   ;;  %vm84_vm8 = vcmask 0  }
   0x4   :  { %v22_v5 = vand.u32 127, %v21_v4  ;;  %s92_s17 = sshll.u32 %s127_s16, 4  ;;  %s93_s17 = int_to_ptr.vmem [resolvable:$true] %s92_s17 }
   0x5   :  { %s102_s1 = scalar_lea.vmem %s93_s17, 16  ;;  %s106_s18 = scalar_lea.vmem %s93_s17, 32 }
   0x6   :  { %p103_p0 = scmp.ne.s32.totalorder %s93_s17, %s102_s1  ;;  %p107_p1 = scmp.lt.s32.totalorder %s93_s17, %s93_s17 }
   0x7   :  { %19 = vmax.xlane.f32.xlu0 %v18_v3  ;;  %p108_p2 = scmp.lt.s32.totalorder %s106_s18, %s102_s1 }
   0x9   :  { %p109_p3 = por %p108_p2, %p107_p1 }
   0xb   :  { %p110_p4 = pnand %p109_p3, %p103_p0 }
  0x90   :  { %v17_v6 = vpop.xlane.xlu0 %16 }
  0x91   :  { %vm23_vm1 = vcmp.eq.f32.partialorder %v12_v0, %v17_v6 }
  0x92   :  { %v25_v7 = vsel %vm23_vm1, %v22_v5, 32 }
  0x93   :  { %v27_v8 = vsel %vm14_vm0, %v25_v7, 2147483647 }
  0x94   :  { %v20_v9 = vpop.xlane.xlu0 %19  ;;  %v29_v10 = vshra.s32 %v27_v8, 16  ;;  %v28_v16 = vand.u32 65535, %v27_v8 }
  0x95   :  { %vm24_vm2 = vcmp.eq.f32.partialorder %v13_v1, %v20_v9 }
  0x96   :  { %v26_v11 = vsel %vm24_vm2, %v22_v5, 32  ;;  %v31_v12 = vcvt.s32.f32 %v29_v10  ;;  %v30_v18 = vcvt.s32.f32 %v28_v16 }
  0x97   :  { %v42_v13 = vsel %vm14_vm0, %v26_v11, 2147483647 }
  0x98   :  { %32 = vmin.xlane.f32.xlu1 %v31_v12  ;;  %v44_v14 = vshra.s32 %v42_v13, 16  ;;  %v43_v19 = vand.u32 65535, %v42_v13 }
  0x9a   :  { %v46_v15 = vcvt.s32.f32 %v44_v14  ;;  %v45_v22 = vcvt.s32.f32 %v43_v19 }
  0x9c   :  { %47 = vmin.xlane.f32.xlu1 %v46_v15 }
 0x125   :  { %v33_v17 = vpop.xlane.xlu1 %32 }
 0x126   :  { %vm34_vm3 = vcmp.eq.f32.partialorder %v31_v12, %v33_v17  ;;  %v39_v24 = vcvt.f32.s32 %v33_v17 }
 0x127   :  { %v35_v20 = vsel %vm34_vm3, %v30_v18, inf }
 0x128   :  { %36 = vmin.xlane.f32.xlu0 %v35_v20  ;;  %v40_v26 = vshll.u32 %v39_v24, 16 }
 0x129   :  { %v48_v21 = vpop.xlane.xlu1 %47 }
 0x12a   :  { %vm49_vm4 = vcmp.eq.f32.partialorder %v46_v15, %v48_v21  ;;  %v54_v27 = vcvt.f32.s32 %v48_v21 }
 0x12b   :  { %v50_v23 = vsel %vm49_vm4, %v45_v22, inf }
 0x12c   :  { %51 = vmin.xlane.f32.xlu1 %v50_v23  ;;  %v55_v32 = vshll.u32 %v54_v27, 16 }
 0x1b5   :  { %v37_v25 = vpop.xlane.xlu0 %36 }
 0x1b6   :  { %v38_v28 = vcvt.f32.s32 %v37_v25 }
 0x1b8   :  { %v41_v30 = vadd.s32 %v40_v26, %v38_v28 }
 0x1b9   :  { %v52_v31 = vpop.xlane.xlu1 %51 }
 0x1ba   :  { %vm59_vm5 = vcmp.ne.s32.totalorder %v41_v30, %v57_v29  ;;  %v53_v33 = vcvt.f32.s32 %v52_v31 }
 0x1bb   :  { %v61_v37 = vsel %vm59_vm5, 1, %v126_v36 }
 0x1bc   :  { %v56_v35 = vadd.s32 %v55_v32, %v53_v33  ;;  %v75_v39 = vsel %vm74_vm6, %v61_v37, 0 }
 0x1be   :  { %vm60_vm7 = vcmp.ne.s32.totalorder %v56_v35, %v58_v34 }
 0x1bf   :  { %v62_v38 = vsel %vm60_vm7, 1, %v126_v36 }
 0x1c0   :  { %v76_v40 = vsel %vm74_vm6, %v62_v38, 0 }
 0x1c1   :  { %v77_v41 = vadd.s32 %v76_v40, %v75_v39 }
 0x1c3   :  { %v78_v42 = vrot.slane %v77_v41, 4 }
 0x1c5   :  { %v79_v43 = vadd.s32 %v78_v42, %v77_v41 }
 0x1c7   :  { %v80_v44 = vrot.slane %v79_v43, 2 }
 0x1c9   :  { %v81_v45 = vadd.s32 %v80_v44, %v79_v43 }
 0x1cb   :  { %v82_v46 = vrot.slane %v81_v45, 1 }
 0x1cd   :  { %v83_v47 = vadd.s32 %v82_v46, %v81_v45 }
 0x1cf   :  { %85 = vst.msk [vmem:[#allocation2] sm:$0x1] %vm84_vm8, %v83_v47 }
 0x1d0   :  { %113 = shalt.err (!%p110_p4)
}
 0x1d1   :  { %s114_s21 = scalar_lea.hbm %s173_s2, 16 }
 0x1d2   :  { %p115_p5 = scmp.ne.s32.totalorder %s173_s2, %s114_s21  ;;  %p118_p6 = scmp.lt.u32.totalorder %s114_s21, %s173_s2 }
 0x1d4   :  { %p120_p7 = pnand %p118_p6, %p115_p5 }
 0x1d6   :  { %123 = shalt.err (!%p120_p7)
}
 0x1d7   :  { %95 = dma.vmem_to_hbm [thread:$0]  %s93_s17, 16, %s173_s2, [#allocation3]  }
 0x1d8   :  { %124 = dma.done.wait [#allocation3], 16  }
 0x1d9   :  { %125 = vsyncadd [#allocation3], 4294967280 }
 0x1da   :  { %99 = vsyncpa [#allocation3], 1 }

</bundles_post_ra>
